<compile_context>
chip_gen: v6e
topology: v6e:2x2x1
jax: 0.10.0
libtpu: 0.0.40
codegen_flags: <defaults>
</compile_context>

<pallas_src>
import functools

import jax
import jax.numpy as jnp
from jax.experimental import pallas as pl
from jax.experimental.pallas import tpu as pltpu

LANE = 128          # padded width for n_states / hidden / n_actions (lane axis)
_NEG_BIG = -1e30    # bias for padded action columns -> exp() underflows to 0


def _round_up(x, m):
    return ((x + m - 1) // m) * m


def _actor_kernel(x_ref, w_ref, b_ref, probs_ref):
    """One batch tile: x (TB, n_states) -> probs (TB, n_actions)."""
    tb, n_states = x_ref.shape
    n_actions = probs_ref.shape[-1]

    b = b_ref[...]                                         # (3, 128) f32, one DMA

    # Load the narrow state tile and zero-pad to 128 lanes in-register, then
    # cast the dot operand to bf16 (accumulation stays f32 on the MXU).
    x = x_ref[...].astype(jnp.float32)                     # (TB, n_states)
    x = jnp.concatenate(
        [x, jnp.zeros((tb, LANE - n_states), jnp.float32)], axis=-1)
    xb = x.astype(jnp.bfloat16)                            # (TB, 128)

    # ---- Linear(n_states, hidden) + ReLU ----
    h1 = jnp.dot(xb, w_ref[0], preferred_element_type=jnp.float32)
    h1 = jnp.maximum(h1 + b[0:1, :], 0.0)

    # ---- Linear(hidden, hidden) + ReLU ----
    h2 = jnp.dot(h1.astype(jnp.bfloat16), w_ref[1],
                 preferred_element_type=jnp.float32)
    h2 = jnp.maximum(h2 + b[1:2, :], 0.0)

    # ---- Linear(hidden, n_actions) ----
    # Padded action columns have zero weights and a -1e30 (f32) bias, so they
    # contribute exactly 0 to the softmax denominator below.
    logits = jnp.dot(h2.astype(jnp.bfloat16), w_ref[2],
                     preferred_element_type=jnp.float32)
    logits = logits + b[2:3, :]

    # ---- Softmax(dim=-1), numerically stable, over the 128-wide slab ----
    m = jnp.max(logits, axis=-1, keepdims=True)
    e = jnp.exp(logits - m)
    denom = jnp.sum(e, axis=-1, keepdims=True)
    # EUP approximate reciprocal + one Newton step: frees VALU slots, keeps
    # row sums within ~1e-7 of 1.
    r = pl.reciprocal(denom, approx=True)
    r = r * (2.0 - denom * r)
    probs = e * r                                          # (TB, 128) f32

    # Only the real action columns are written back to HBM.
    probs_ref[...] = probs[:, :n_actions].astype(probs_ref.dtype)


def init_params(key, n_states, n_actions, hidden_dim):
    """Deterministic synthetic init (PyTorch-Linear-style uniform bounds).

    Weights stored as [in_features, out_features] (transposed vs. PyTorch) so
    the kernel computes x @ w + b.
    """
    ks = jax.random.split(key, 6)

    def linear(kw, kb, fan_in, fan_out):
        bound = 1.0 / jnp.sqrt(fan_in)
        w = jax.random.uniform(kw, (fan_in, fan_out), jnp.float32, -bound, bound)
        b = jax.random.uniform(kb, (fan_out,), jnp.float32, -bound, bound)
        return w, b

    w1, b1 = linear(ks[0], ks[1], n_states, hidden_dim)
    w2, b2 = linear(ks[2], ks[3], hidden_dim, hidden_dim)
    w3, b3 = linear(ks[4], ks[5], hidden_dim, n_actions)
    return (w1, b1, w2, b2, w3, b3)


def pack_params(params, n_states, n_actions, hidden_dim):
    """Pack the 6 parameter tensors into 2 zero-padded, lane-dense slabs.

    W: (3, 128, 128) bf16 weight slab (halved DMA, native MXU rate).
    B: (3, 128)      f32 bias slab; padded action columns of layer 3 get a
                     -1e30 bias so they drop out of the softmax.
    """
    w1, b1, w2, b2, w3, b3 = params
    W = jnp.zeros((3, LANE, LANE), jnp.float32)
    W = W.at[0, :n_states, :hidden_dim].set(w1)
    W = W.at[1, :hidden_dim, :hidden_dim].set(w2)
    W = W.at[2, :hidden_dim, :n_actions].set(w3)
    W = W.astype(jnp.bfloat16)

    B = jnp.zeros((3, LANE), jnp.float32)
    B = B.at[0, :hidden_dim].set(b1.reshape(-1))
    B = B.at[1, :hidden_dim].set(b2.reshape(-1))
    B = B.at[2].set(jnp.full((LANE,), _NEG_BIG, jnp.float32))
    B = B.at[2, :n_actions].set(b3.reshape(-1))
    return W, B


@functools.partial(jax.jit, static_argnames=("n_actions", "tb"))
def actor_forward(state, packed, n_actions, *, tb=1024):
    """Returns the Categorical `probs`, shape [B, n_actions], float32."""
    W, Bs = packed
    B, n_states = state.shape

    # Pad the batch only to a multiple of 8, then pick a tile so that
    #   * there are >= 2 grid steps whenever B >= 16 (both v7x TCs used),
    #   * each step is at most `tb` rows,
    #   * total row padding stays small (never padded up to a full tb).
    B8 = _round_up(B, 8)
    n_steps = max(1, -(-B8 // tb))
    if B8 >= 16:
        n_steps = max(n_steps, 2)
    TB = _round_up(-(-B8 // n_steps), 8)
    B_pad = TB * n_steps

    x = state
    if B_pad != B:
        x = jnp.pad(state, ((0, B_pad - B), (0, 0)))

    probs_pad = pl.pallas_call(
        _actor_kernel,
        out_shape=jax.ShapeDtypeStruct((B_pad, n_actions), jnp.float32),
        grid=(n_steps,),
        in_specs=[
            # state tile, narrow last dim (= full array dim -> legal block)
            pl.BlockSpec((TB, n_states), lambda i: (i, 0)),
            # packed weights / biases: constant block index -> fetched once
            pl.BlockSpec((3, LANE, LANE), lambda i: (0, 0, 0)),
            pl.BlockSpec((3, LANE), lambda i: (0, 0)),
        ],
        out_specs=pl.BlockSpec((TB, n_actions), lambda i: (i, 0)),
        compiler_params=pltpu.CompilerParams(
            dimension_semantics=("parallel",)),   # shards batch across TCs
    )(x, W, Bs)

    return probs_pad[:B]


def _ref_forward(state, params):
    """Pure-JAX fp32 reference of the PyTorch module."""
    w1, b1, w2, b2, w3, b3 = params
    h1 = jax.nn.relu(state @ w1 + b1)
    h2 = jax.nn.relu(h1 @ w2 + b2)
    logits = h2 @ w3 + b3
    return jax.nn.softmax(logits, axis=-1)


def _ref_forward_bf16(state, params):
    """Pure-JAX reference with the kernel's bf16-dot / f32-accumulate numerics."""
    w1, b1, w2, b2, w3, b3 = params
    c = lambda a: a.astype(jnp.bfloat16)
    h1 = jax.nn.relu(
        jnp.dot(c(state), c(w1), preferred_element_type=jnp.float32) + b1)
    h2 = jax.nn.relu(
        jnp.dot(c(h1), c(w2), preferred_element_type=jnp.float32) + b2)
    logits = jnp.dot(c(h2), c(w3), preferred_element_type=jnp.float32) + b3
    return jax.nn.softmax(logits, axis=-1)


if __name__ == "__main__":
    # Small RL-actor-head shapes; the batch is tiled by the kernel's grid so
    # many env states / timesteps can be stacked into a single call.
    B, n_states, n_actions, hidden_dim = 64, 8, 4, 32

    key = jax.random.PRNGKey(0)
    k_state, k_params = jax.random.split(key)

    state = jax.random.normal(k_state, (B, n_states), dtype=jnp.float32)
    params = init_params(k_params, n_states, n_actions, hidden_dim)
    packed = pack_params(params, n_states, n_actions, hidden_dim)

    probs = jax.block_until_ready(actor_forward(state, packed, n_actions))

    # Correctness: shape, finiteness, normalization, and numerics.
    assert probs.shape == (B, n_actions)
    assert bool(jnp.all(jnp.isfinite(probs)))
    assert bool(jnp.allclose(jnp.sum(probs, axis=-1), 1.0, atol=1e-4))

    ref32 = _ref_forward(state, params)
    ref16 = _ref_forward_bf16(state, params)
    # bf16-faithful reference (tight) and fp32 PyTorch-equivalent (loose,
    # tolerance accounts for the explicit bf16 dot operands).
    assert bool(jnp.allclose(probs, ref16, atol=5e-3, rtol=5e-3))
    assert bool(jnp.allclose(probs, ref32, atol=2e-2, rtol=2e-2))

    # Categorical(dist) glue: sample actions from the kernel's `probs`.
    actions = jax.random.categorical(jax.random.PRNGKey(1), jnp.log(probs))
    jax.block_until_ready(actions)
    assert actions.shape == (B,)

    print("KERNEL_OK")
</pallas_src>

<mosaic_0001>
module attributes {stable_mosaic.version = 11 : i64} {
  func.func @_actor_kernel(%arg0: i32, %arg1: memref<32x8xf32, #tpu.memory_space<vmem>>, %arg2: memref<3x128x128xbf16, #tpu.memory_space<vmem>>, %arg3: memref<3x128xf32, #tpu.memory_space<vmem>>, %arg4: memref<32x4xf32, #tpu.memory_space<vmem>>) attributes {dimension_semantics = [#tpu.dimension_semantics<parallel>], iteration_bounds = array<i64: 2>, scalar_prefetch = 0 : i64, scratch_operands = 0 : i64, tpu.core_type = #tpu.core_type<tc>, window_params = [{transform_indices = @transform_0, window_bounds = array<i64: 32, 8>}, {pipeline_mode = #tpu.pipeline_mode<synchronous>, transform_indices = @transform_1, window_bounds = array<i64: 3, 128, 128>}, {pipeline_mode = #tpu.pipeline_mode<synchronous>, transform_indices = @transform_2, window_bounds = array<i64: 3, 128>}, {transform_indices = @transform_3, window_bounds = array<i64: 32, 4>}]} {
    %c0 = arith.constant 0 : index
    %c0_0 = arith.constant 0 : index
    %0 = vector.load %arg3[%c0, %c0_0] : memref<3x128xf32, #tpu.memory_space<vmem>>, vector<3x128xf32>
    %c0_1 = arith.constant 0 : index
    %c0_2 = arith.constant 0 : index
    %1 = vector.load %arg1[%c0_1, %c0_2] : memref<32x8xf32, #tpu.memory_space<vmem>>, vector<32x8xf32>
    %cst = arith.constant 0.000000e+00 : f32
    %2 = vector.broadcast %cst : f32 to vector<32x120xf32>
    %3 = tpu.concatenate %1, %2 in 1 : vector<32x8xf32>, vector<32x120xf32> -> vector<32x128xf32>
    %4 = arith.truncf %3 : vector<32x128xf32> to vector<32x128xbf16>
    %c0_3 = arith.constant 0 : index
    %c0_4 = arith.constant 0 : index
    %c0_5 = arith.constant 0 : index
    %5 = vector.load %arg2[%c0_3, %c0_4, %c0_5] : memref<3x128x128xbf16, #tpu.memory_space<vmem>>, vector<1x128x128xbf16>
    %6 = vector.shape_cast %5 : vector<1x128x128xbf16> to vector<128x128xbf16>
    %cst_6 = arith.constant dense<0.000000e+00> : vector<32x128xf32>
    %7 = tpu.matmul %4, %6, %cst_6 {dimension_numbers = #tpu.dot_dimension_numbers<[1], [0], [0], [1], [0, 0, 1, 1], [], []>} : vector<32x128xbf16>, vector<128x128xbf16>, vector<32x128xf32> -> vector<32x128xf32>
    %8 = vector.extract_strided_slice %0 {offsets = [0, 0], sizes = [1, 128], strides = [1, 1]} : vector<3x128xf32> to vector<1x128xf32>
    %9 = vector.broadcast %8 : vector<1x128xf32> to vector<32x128xf32>
    %10 = arith.addf %7, %9 : vector<32x128xf32>
    %cst_7 = arith.constant 0.000000e+00 : f32
    %11 = vector.broadcast %cst_7 : f32 to vector<32x128xf32>
    %12 = arith.maximumf %10, %11 : vector<32x128xf32>
    %13 = arith.truncf %12 : vector<32x128xf32> to vector<32x128xbf16>
    %c1 = arith.constant 1 : index
    %c0_8 = arith.constant 0 : index
    %c0_9 = arith.constant 0 : index
    %14 = vector.load %arg2[%c1, %c0_8, %c0_9] : memref<3x128x128xbf16, #tpu.memory_space<vmem>>, vector<1x128x128xbf16>
    %15 = vector.shape_cast %14 : vector<1x128x128xbf16> to vector<128x128xbf16>
    %cst_10 = arith.constant dense<0.000000e+00> : vector<32x128xf32>
    %16 = tpu.matmul %13, %15, %cst_10 {dimension_numbers = #tpu.dot_dimension_numbers<[1], [0], [0], [1], [0, 0, 1, 1], [], []>} : vector<32x128xbf16>, vector<128x128xbf16>, vector<32x128xf32> -> vector<32x128xf32>
    %17 = vector.extract_strided_slice %0 {offsets = [1, 0], sizes = [1, 128], strides = [1, 1]} : vector<3x128xf32> to vector<1x128xf32>
    %18 = vector.broadcast %17 : vector<1x128xf32> to vector<32x128xf32>
    %19 = arith.addf %16, %18 : vector<32x128xf32>
    %cst_11 = arith.constant 0.000000e+00 : f32
    %20 = vector.broadcast %cst_11 : f32 to vector<32x128xf32>
    %21 = arith.maximumf %19, %20 : vector<32x128xf32>
    %22 = arith.truncf %21 : vector<32x128xf32> to vector<32x128xbf16>
    %c2 = arith.constant 2 : index
    %c0_12 = arith.constant 0 : index
    %c0_13 = arith.constant 0 : index
    %23 = vector.load %arg2[%c2, %c0_12, %c0_13] : memref<3x128x128xbf16, #tpu.memory_space<vmem>>, vector<1x128x128xbf16>
    %24 = vector.shape_cast %23 : vector<1x128x128xbf16> to vector<128x128xbf16>
    %cst_14 = arith.constant dense<0.000000e+00> : vector<32x128xf32>
    %25 = tpu.matmul %22, %24, %cst_14 {dimension_numbers = #tpu.dot_dimension_numbers<[1], [0], [0], [1], [0, 0, 1, 1], [], []>} : vector<32x128xbf16>, vector<128x128xbf16>, vector<32x128xf32> -> vector<32x128xf32>
    %26 = vector.extract_strided_slice %0 {offsets = [2, 0], sizes = [1, 128], strides = [1, 1]} : vector<3x128xf32> to vector<1x128xf32>
    %27 = vector.broadcast %26 : vector<1x128xf32> to vector<32x128xf32>
    %28 = arith.addf %25, %27 : vector<32x128xf32>
    %cst_15 = arith.constant dense<0xFF800000> : vector<32xf32>
    %29 = vector.multi_reduction <maximumf>, %28, %cst_15 [1] : vector<32x128xf32> to vector<32xf32>
    %30 = vector.shape_cast %29 : vector<32xf32> to vector<32x1xf32>
    %31 = vector.broadcast %30 : vector<32x1xf32> to vector<32x128xf32>
    %32 = arith.subf %28, %31 : vector<32x128xf32>
    %33 = math.exp %32 : vector<32x128xf32>
    %cst_16 = arith.constant dense<0.000000e+00> : vector<32xf32>
    %34 = vector.multi_reduction <add>, %33, %cst_16 [1] : vector<32x128xf32> to vector<32xf32>
    %35 = vector.shape_cast %34 : vector<32xf32> to vector<32x1xf32>
    %36 = tpu.reciprocal %35 {approx = true} : vector<32x1xf32> -> vector<32x1xf32>
    %37 = arith.mulf %35, %36 : vector<32x1xf32>
    %cst_17 = arith.constant 2.000000e+00 : f32
    %38 = vector.broadcast %cst_17 : f32 to vector<32x1xf32>
    %39 = arith.subf %38, %37 : vector<32x1xf32>
    %40 = arith.mulf %36, %39 : vector<32x1xf32>
    %41 = vector.broadcast %40 : vector<32x1xf32> to vector<32x128xf32>
    %42 = arith.mulf %33, %41 : vector<32x128xf32>
    %43 = vector.extract_strided_slice %42 {offsets = [0, 0], sizes = [32, 4], strides = [1, 1]} : vector<32x128xf32> to vector<32x4xf32>
    %c0_18 = arith.constant 0 : index
    %c0_19 = arith.constant 0 : index
    %44 = vector.load %arg4[%c0_18, %c0_19] : memref<32x4xf32, #tpu.memory_space<vmem>>, vector<32x4xf32>
    tpu.vector_store %arg4[%c0_18, %c0_19], %43 {strides = array<i32>} : memref<32x4xf32, #tpu.memory_space<vmem>>, vector<32x4xf32>,
    return
  }
  func.func @transform_0(%arg0: i32) -> (i32, i32) {
    %c0_i32 = arith.constant 0 : i32
    %c0_i32_0 = arith.constant 0 : i32
    return %arg0, %c0_i32 : i32, i32
  }
  func.func @transform_1(%arg0: i32) -> (i32, i32, i32) {
    %c0_i32 = arith.constant 0 : i32
    %c0_i32_0 = arith.constant 0 : i32
    %c0_i32_1 = arith.constant 0 : i32
    %c0_i32_2 = arith.constant 0 : i32
    return %c0_i32, %c0_i32_0, %c0_i32_1 : i32, i32, i32
  }
  func.func @transform_2(%arg0: i32) -> (i32, i32) {
    %c0_i32 = arith.constant 0 : i32
    %c0_i32_0 = arith.constant 0 : i32
    %c0_i32_1 = arith.constant 0 : i32
    return %c0_i32, %c0_i32_0 : i32, i32
  }
  func.func @transform_3(%arg0: i32) -> (i32, i32) {
    %c0_i32 = arith.constant 0 : i32
    %c0_i32_0 = arith.constant 0 : i32
    return %arg0, %c0_i32 : i32, i32
  }
}

</mosaic_0001>

<bundles_post_ra>
// kernel: actor_forward.1
= control target key start
LH: loop header
LB: loop body
LE: loop exit
PB: predicated region body
PF: predicated region fallthrough
CT: control target
= control target key end

     0   :  { %8 = vsyncpa [#allocation3], 0  ;;  %s943_s12 = smov 0   ;;  %s1009_s0 = inlined_call_operand.vmem [shape: f32[64,8], index: 0, kind: input, shape index: {}]   ;;  %s1010_s1 = inlined_call_operand.hbm [shape: bf16[3,128,128], index: 1, kind: input, shape index: {}]   ;;  %s1011_s2 = inlined_call_operand.vmem [shape: f32[3,128], index: 2, kind: input, shape index: {}]   ;;  %s1012_s3 = inlined_call_operand.vmem [shape: f32[64,4], index: 3, kind: output, shape index: {}]  }
   0x1 LB: > { %s688_s13 = sadd.s32 4294967295, %s918_s12   ;;  %p690_p0 = scmp.ge.s32.totalorder %s918_s12, 1  ;;  %s918_s12 = sphi %s943_s12, %s14_s12  }
   0x2   : > { %p113_p1 = scmp.lt.s32.totalorder %s918_s12, 3  ;;  %s920_s14 = smov [#allocation2]  }
   0x3   : > { %s125_s15 = sshll.u32 %s920_s14, 4  ;;  %p955_p3 = scmp.eq.s32.totalorder %s688_s13, 0  ;;  %s126_s15 = int_to_ptr.vmem [resolvable:$true] %s125_s15 }
   0x4   : > { %p951_p2 = pnand %p690_p0, %p113_p1  ;;  %s893_s18 = scalar_lea.vmem %s126_s15, 3072 }
   0x5   : > { %p894_p7 = scmp.ne.s32.totalorder %s126_s15, %s893_s18  ;;  %p901_p10 = scmp.lt.s32.totalorder %s126_s15, %s126_s15 }
   0x6   : > { %p825_p4 = pneg %p951_p2  ;;  %p902_p11 = scmp.lt.s32.totalorder %s893_s18, %s893_s18 }
   0x8   : > { %p826_p5 = pnand %p955_p3, %p825_p4  ;;  %p903_p12 = por %p902_p11, %p901_p10 }
   0xa   : > { %p884_p6 = pneg %p826_p5 }
   0xc   : > { %p896_p8 = pnand %p894_p7, %p884_p6 }
   0xe   : > { %p897_p9 = pneg %p896_p8 }
  0x10   : > { %p904_p13 = pnand %p903_p12, %p897_p9 }
  0x12   : > { %907 = shalt.err (!%p904_p13)
}
  0x13   : > { %s921_s19 = smov 64   ;;  %s922_s20 = smov 4  }
  0x14   : > { %828 = dma.hbm_to_vmem [thread:$0]  (!%p826_p5), %s1010_s1, 3072, %s126_s15, [#allocation3], %s921_s19, %s921_s19, %s922_s20  }
  0x15   : > { %153 = sbr.rel (%p951_p2) target bundleno = 994 (0x3e2), region = 32 }
  0x1a   : > { %913 = dma.done.wait (%p955_p3), [#allocation3], 3072  }
  0x1b   : > { %915 = vsyncadd (%p955_p3), [#allocation3], 4294964224  ;;  %s695_s23 = sshll.u32 %s688_s13, 2  ;;  %v842_v0 = vld [vmem:[#allocation2 + $0x38] sm:$0xff]   ;;  %v843_v1 = vld [vmem:[#allocation2 + $0x30] sm:$0xff]   ;;  %vm195_vm0 = vcmask 64512   ;;  %v218_v28 = vlaneseq }
  0x1c   : > { %p178_p0 = scmp.lt.s32.totalorder %s695_s23, 7  ;;  %761 = vmatprep.subr.bf16.mxu0 %v842_v0  ;;  %v844_v2 = vld [vmem:[#allocation2 + $0x28] sm:$0xff]   ;;  %vm982_vm1 = vmpackc.low %vm195_vm0, %vm195_vm0  ;;  %v845_v4 = vld [vmem:[#allocation2 + $0x20] sm:$0xff]   ;;  %vm615_vm2 = vcmask 31744  }
  0x1d   : > { %762 = vmatpush3.bf16.msra.mxu0 %v842_v0  ;;  %v850_v8 = vld [vmem:[#allocation2 + $0x78] sm:$0xff]   ;;  %v851_v9 = vld [vmem:[#allocation2 + $0x70] sm:$0xff]   ;;  %v852_v12 = vld [vmem:[#allocation2 + $0x68] sm:$0xff]   ;;  %v219_v29 = vshrl.u32 %v218_v28, 7 }
  0x1e   : > { %s1018_s23 = smov (!%p178_p0, %s695_s23), 7  ;;  %763 = vmatprep.subr.bf16.mxu0 %v843_v1  ;;  %v846_v10 = vld [vmem:[#allocation2 + $0x18] sm:$0xff]   ;;  %781 = vmatprep.subr.bf16.mxu1 %v850_v8  ;;  %v847_v11 = vld [vmem:[#allocation2 + $0x10] sm:$0xff]   ;;  %v853_v13 = vld [vmem:[#allocation2 + $0x60] sm:$0xff]  }
  0x1f   : > { %s696_s24 = sshll.u32 %s1018_s23, 3  ;;  %782 = vmatpush3.bf16.msra.mxu1 %v850_v8  ;;  %v848_v14 = vld [vmem:[#allocation2 + $0x8] sm:$0xff]   ;;  %v854_v15 = vld [vmem:[#allocation2 + $0x58] sm:$0xff]   ;;  %v849_v16 = vld [vmem:[#allocation2] sm:$0xff]   ;;  %v220_v30 = vsub.s32 0, %v219_v29  ;;  %v344_v50 = vsub.s32 1, %v219_v29 }
  0x20   : > { %s980_s27 = scalar_lea.vmem %s1009_s0, %s696_s24  ;;  %783 = vmatprep.subr.bf16.mxu1 %v851_v9  ;;  %v855_v20 = vld [vmem:[#allocation2 + $0x50] sm:$0xff]   ;;  %v856_v21 = vld [vmem:[#allocation2 + $0x48] sm:$0xff]   ;;  %v857_v22 = vld [vmem:[#allocation2 + $0x40] sm:$0xff]   ;;  %s187_s5 = scalar_lea.vmem %s1012_s3, %s696_s24 }
  0x21   : > { %764 = vmatpush3.bf16.msra.mxu0 %v843_v1  ;;  %v191_v5 = vld [vmem:[%s980_s27] sm:$0xff]  ;;  %v192_v6 = vld [vmem:[%s980_s27 + $0x8] sm:$0xff]  ;;  %v193_v17 = vld [vmem:[%s980_s27 + $0x10] sm:$0xff] }
  0x22   : > { %765 = vmatprep.subr.bf16.mxu0 %v844_v2  ;;  %v708_v7 = vpack.c.bf16 %v192_v6, %v191_v5  ;;  %v194_v18 = vld [vmem:[%s980_s27 + $0x18] sm:$0xff]  ;;  %v859_v24 = vld [vmem:[#allocation2 + $0xb0] sm:$0xff]   ;;  %v860_v25 = vld [vmem:[#allocation2 + $0xa8] sm:$0xff]  }
  0x23   : > { %784 = vmatpush3.bf16.msra.mxu1 %v851_v9  ;;  %v711_v19 = vpack.c.bf16 %v194_v18, %v193_v17  ;;  %v858_v23 = vld [vmem:[#allocation2 + $0xb8] sm:$0xff]   ;;  %v861_v26 = vld [vmem:[#allocation2 + $0xa0] sm:$0xff]   ;;  %v863_v47 = vld [vmem:[#allocation2 + $0x90] sm:$0xff]  }
  0x24   : > { %777 = vmatprep.mubr.msk.bf16.mxu0 %vm982_vm1, %v708_v7  ;;  %785 = vmatprep.subr.bf16.mxu1 %v852_v12  ;;  %v862_v27 = vld [vmem:[#allocation2 + $0x98] sm:$0xff]   ;;  %v190_v31 = vld [vmem:[%s1011_s2] sm:$0x7]  ;;  %v864_v48 = vld [vmem:[#allocation2 + $0x88] sm:$0xff]  }
  0x25   : > { %766 = vmatpush3.bf16.msra.mxu0 %v844_v2  ;;  %v221_v33 = vrot.slane %v190_v31, %v220_v30  ;;  %v865_v49 = vld [vmem:[#allocation2 + $0x80] sm:$0xff]   ;;  %v345_v52 = vrot.slane %v190_v31, %v344_v50  ;;  %v468_v2 = vsub.s32 2, %v219_v29 }
  0x26   : > { %767 = vmatprep.subr.bf16.mxu0 %v845_v4 }
  0x27   : > { %786 = vmatpush3.bf16.msra.mxu1 %v852_v12  ;;  %v469_v3 = vrot.slane %v190_v31, %v468_v2 }
  0x28   : > { %787 = vmatprep.subr.bf16.mxu1 %v853_v13 }
  0x29   : > { %768 = vmatpush3.bf16.msra.mxu0 %v845_v4 }
  0x2a   : > { %769 = vmatprep.subr.bf16.mxu0 %v846_v10 }
  0x2b   : > { %788 = vmatpush3.bf16.msra.mxu1 %v853_v13 }
  0x2c   : > { %789 = vmatprep.subr.bf16.mxu1 %v854_v15 }
  0x2d   : > { %770 = vmatpush3.bf16.msra.mxu0 %v846_v10 }
  0x2e   : > { %771 = vmatprep.subr.bf16.mxu0 %v847_v11 }
  0x2f   : > { %790 = vmatpush3.bf16.msra.mxu1 %v854_v15 }
  0x30   : > { %791 = vmatprep.subr.bf16.mxu1 %v855_v20 }
  0x31   : > { %772 = vmatpush3.bf16.msra.mxu0 %v847_v11 }
  0x32   : > { %773 = vmatprep.subr.bf16.mxu0 %v848_v14 }
  0x33   : > { %792 = vmatpush3.bf16.msra.mxu1 %v855_v20 }
  0x34   : > { %793 = vmatprep.subr.bf16.mxu1 %v856_v21 }
  0x35   : > { %774 = vmatpush3.bf16.msra.mxu0 %v848_v14 }
  0x36   : > { %775 = vmatprep.subr.bf16.mxu0 %v849_v16 }
  0x37   : > { %794 = vmatpush3.bf16.msra.mxu1 %v856_v21 }
  0x38   : > { %795 = vmatprep.subr.bf16.mxu1 %v857_v22 }
  0x39   : > { %776 = vmatpush3.bf16.msra.mxu0 %v849_v16 }
  0x3a   : > { %801 = vmatprep.subr.bf16.mxu0 %v858_v23 }
  0x3b   : > { %796 = vmatpush3.bf16.msra.mxu1 %v857_v22 }
  0x3c   : > { %778 = vmatmul.mubr.msk.bf16.vlgmr.msra.gmra.mxu0 %vm982_vm1, %v711_v19 }
  0x3d   : > { %802 = vmatpush3.bf16.msra.mxu0 %v858_v23 }
  0x3e   : > { %803 = vmatprep.subr.bf16.mxu0 %v859_v24 }
  0x41   : > { %804 = vmatpush3.bf16.msra.mxu0 %v859_v24 }
  0x42   : > { %805 = vmatprep.subr.bf16.mxu0 %v860_v25 }
  0x45   : > { %806 = vmatpush3.bf16.msra.mxu0 %v860_v25 }
  0x46   : > { %807 = vmatprep.subr.bf16.mxu0 %v861_v26 }
  0x49   : > { %808 = vmatpush3.bf16.msra.mxu0 %v861_v26 }
  0x4a   : > { %809 = vmatprep.subr.bf16.mxu0 %v862_v27 }
  0x4d   : > { %810 = vmatpush3.bf16.msra.mxu0 %v862_v27 }
  0x4e   : > { %811 = vmatprep.subr.bf16.mxu0 %v863_v47 }
  0x51   : > { %812 = vmatpush3.bf16.msra.mxu0 %v863_v47 }
  0x52   : > { %813 = vmatprep.subr.bf16.mxu0 %v864_v48 }
  0x55   : > { %814 = vmatpush3.bf16.msra.mxu0 %v864_v48 }
  0x56   : > { %815 = vmatprep.subr.bf16.mxu0 %v865_v49 }
  0x59   : > { %816 = vmatpush3.bf16.msra.mxu0 %v865_v49 }
  0xfc   : > { %v779_v32 = vpop.f32.mrf.mxu0 }
  0xfd   : > { %v313_v38 = vadd.f32 %v779_v32, %v221_v33 }
  0xfe   : > { %v304_v34 = vpop.f32.mrf.mxu0 }
  0xff   : > { %v305_v36 = vadd.f32 %v304_v34, %v221_v33  ;;  %v321_v44 = vmax.f32 %v313_v38, 0.0 }
 0x100   : > { %v780_v35 = vpop.f32.mrf.mxu0 }
 0x101   : > { %v316_v37 = vadd.f32 %v780_v35, %v221_v33  ;;  %v319_v42 = vmax.f32 %v305_v36, 0.0 }
 0x102   : > { %v307_v39 = vpop.f32.mrf.mxu0 }
 0x103   : > { %v308_v40 = vadd.f32 %v307_v39, %v221_v33  ;;  %v322_v41 = vmax.f32 %v316_v37, 0.0 }
 0x105   : > { %v320_v43 = vmax.f32 %v308_v40, 0.0  ;;  %v324_v46 = vpack.c.bf16 %v322_v41, %v321_v44 }
 0x107   : > { %v323_v45 = vpack.c.bf16 %v320_v43, %v319_v42 }
 0x109   : > { %797 = vmatprep.mubr.bf16.mxu1 %v323_v45 }
 0x10a   : > { %798 = vmatmul.mubr.bf16.vlgmr.msra.gmra.mxu1 %v324_v46 }
 0x1ca   : > { %v799_v51 = vpop.f32.mrf.mxu1 }
 0x1cb   : > { %v437_v57 = vadd.f32 %v799_v51, %v345_v52 }
 0x1cc   : > { %v428_v53 = vpop.f32.mrf.mxu1 }
 0x1cd   : > { %v429_v55 = vadd.f32 %v428_v53, %v345_v52  ;;  %v445_v63 = vmax.f32 %v437_v57, 0.0 }
 0x1ce   : > { %v800_v54 = vpop.f32.mrf.mxu1 }
 0x1cf   : > { %v440_v56 = vadd.f32 %v800_v54, %v345_v52  ;;  %v443_v61 = vmax.f32 %v429_v55, 0.0 }
 0x1d0   : > { %v431_v58 = vpop.f32.mrf.mxu1 }
 0x1d1   : > { %v432_v59 = vadd.f32 %v431_v58, %v345_v52  ;;  %v446_v60 = vmax.f32 %v440_v56, 0.0 }
 0x1d3   : > { %v444_v62 = vmax.f32 %v432_v59, 0.0  ;;  %v448_v1 = vpack.c.bf16 %v446_v60, %v445_v63 }
 0x1d5   : > { %v447_v0 = vpack.c.bf16 %v444_v62, %v443_v61 }
 0x1d7   : > { %817 = vmatprep.mubr.bf16.mxu0 %v447_v0 }
 0x1d8   : > { %818 = vmatmul.mubr.bf16.vlgmr.msra.gmra.mxu0 %v448_v1 }
 0x298   : > { %v819_v4 = vpop.f32.mrf.mxu0 }
 0x299   : > { %v561_v5 = vadd.f32 %v819_v4, %v469_v3 }
 0x29a   : > { %v552_v6 = vpop.f32.mrf.mxu0 }
 0x29b   : > { %v553_v7 = vadd.f32 %v552_v6, %v469_v3  ;;  %571 = vmax.xlane.f32.xlu1 %v561_v5 }
 0x29c   : > { %v820_v8 = vpop.f32.mrf.mxu0 }
 0x29d   : > { %v564_v9 = vadd.f32 %v820_v8, %v469_v3  ;;  %567 = vmax.xlane.f32.xlu0 %v553_v7 }
 0x29e   : > { %v555_v10 = vpop.f32.mrf.mxu0 }
 0x29f   : > { %v556_v11 = vadd.f32 %v555_v10, %v469_v3  ;;  %573 = vmax.xlane.f32.xlu1 %v564_v9 }
 0x2a1   : > { %569 = vmax.xlane.f32.xlu0 %v556_v11 }
 0x324   : > { %v572_v12 = vpop.xlane.xlu1 %571 }
 0x325   : > { %v577_v13 = vsub.f32 %v561_v5, %v572_v12 }
 0x326   : > { %v568_v14 = vpop.xlane.xlu0 %567 }
 0x327   : > { %v575_v15 = vsub.f32 %v553_v7, %v568_v14  ;;  %v583_v18 = vmul.f32 1.442695, %v577_v13 }
 0x328   : > { %v574_v16 = vpop.xlane.xlu1 %573 }
 0x329   : > { %v579_v17 = vmul.f32 1.442695, %v575_v15  ;;  %v578_v20 = vsub.f32 %v564_v9, %v574_v16 }
 0x32a   : > { %v570_v19 = vpop.xlane.xlu0 %569 }
 0x32b   : > { %866 = vpow2.f32 %v579_v17  ;;  %v576_v21 = vsub.f32 %v556_v11, %v570_v19  ;;  %v585_v23 = vmul.f32 1.442695, %v578_v20 }
 0x32c   : > { %868 = vpow2.f32 %v583_v18 }
 0x32d   : > { %v581_v22 = vmul.f32 1.442695, %v576_v21 }
 0x32f   : > { %870 = vpow2.f32 %v581_v22 }
 0x330   : > { %872 = vpow2.f32 %v585_v23 }
 0x338   : > { %v867_v24 = vpop.eup %866 }
 0x339   : > { %587 = vadd.xlane.f32.xlu0 %v867_v24  ;;  %v869_v25 = vpop.eup %868 }
 0x33c   : > { %v871_v26 = vpop.eup %870 }
 0x33d   : > { %591 = vadd.xlane.f32.xlu0 %v869_v25  ;;  %589 = vadd.xlane.f32.xlu1 %v871_v26  ;;  %v873_v27 = vpop.eup %872 }
 0x341   : > { %593 = vadd.xlane.f32.xlu1 %v873_v27 }
 0x3c2   : > { %v588_v28 = vpop.xlane.xlu0 %587 }
 0x3c3   : > { %874 = vrcp.f32 %v588_v28 }
 0x3c6   : > { %v590_v29 = vpop.xlane.xlu1 %589  ;;  %v592_v30 = vpop.xlane.xlu0 %591 }
 0x3c7   : > { %876 = vrcp.f32 %v590_v29 }
 0x3c8   : > { %878 = vrcp.f32 %v592_v30 }
 0x3ca   : > { %v594_v31 = vpop.xlane.xlu1 %593 }
 0x3cb   : > { %880 = vrcp.f32 %v594_v31 }
 0x3d0   : > { %v875_v32 = vpop.eup %874 }
 0x3d1   : > { %v599_v33 = vmul.f32 %v875_v32, %v588_v28 }
 0x3d3   : > { %v603_v34 = vsub.f32 2.0, %v599_v33 }
 0x3d4   : > { %v877_v35 = vpop.eup %876 }
 0x3d5   : > { %v879_v36 = vpop.eup %878  ;;  %v607_v37 = vmul.f32 %v875_v32, %v603_v34  ;;  %v600_v38 = vmul.f32 %v877_v35, %v590_v29 }
 0x3d6   : > { %v601_v39 = vmul.f32 %v879_v36, %v592_v30 }
 0x3d7   : > { %v611_v40 = vmul.f32 %v867_v24, %v607_v37  ;;  %v604_v41 = vsub.f32 2.0, %v600_v38 }
 0x3d8   : > { %v881_v42 = vpop.eup %880  ;;  %v605_v43 = vsub.f32 2.0, %v601_v39 }
 0x3d9   : > { %616 = vst.msk [vmem:[%s187_s5] sm:$0xff] %vm615_vm2, %v611_v40  ;;  %v608_v44 = vmul.f32 %v877_v35, %v604_v41  ;;  %v602_v45 = vmul.f32 %v881_v42, %v594_v31 }
 0x3da   : > { %v609_v46 = vmul.f32 %v879_v36, %v605_v43 }
 0x3db   : > { %v612_v47 = vmul.f32 %v871_v26, %v608_v44  ;;  %v606_v48 = vsub.f32 2.0, %v602_v45 }
 0x3dc   : > { %v613_v49 = vmul.f32 %v869_v25, %v609_v46 }
 0x3dd   : > { %617 = vst.msk [vmem:[%s187_s5 + $0x8] sm:$0xff] %vm615_vm2, %v612_v47  ;;  %v610_v50 = vmul.f32 %v881_v42, %v606_v48 }
 0x3de   : > { %618 = vst.msk [vmem:[%s187_s5 + $0x10] sm:$0xff] %vm615_vm2, %v613_v49 }
 0x3df   : > { %v614_v51 = vmul.f32 %v873_v27, %v610_v50 }
 0x3e1   : > { %619 = vst.msk [vmem:[%s187_s5 + $0x18] sm:$0xff] %vm615_vm2, %v614_v51 }
 0x3e2 PF: > { %s14_s12 = sadd.s32 1, %s918_s12  }
 0x3e3   : > { %p11_p1 = scmp.ge.s32.totalorder %s14_s12, 4  }
 0x3e5   :  { %13 = sbr.rel (!%p11_p1) target bundleno = 1 (0x1), region = 69 }
 0x3ea   :  { %642 = vsyncpa [#allocation3], 1 }
 0x3eb   :  { %644 = vsyncpa [#allocation3 + $0x1], 1 }

</bundles_post_ra>
